<compile_context>
chip_gen: v7x
topology: tpu7x:2x2x1
jax: 0.10.0
libtpu: 0.0.40
codegen_flags: <defaults>
</compile_context>

<pallas_src>
import functools

import jax
import jax.numpy as jnp
from jax.experimental import pallas as pl
from jax.experimental.pallas import tpu as pltpu


def _round_up(x, m):
    return ((x + m - 1) // m) * m


def _pick_tile(n, target=512, minimum=128):
    """Largest tile (multiple of 128, <= target) keeping >=2 row tiles and
    bounded padding waste.  Small per-step overhead (~0.35us) is amortised by
    big tiles; >=2 row tiles keeps both v7x TensorCores busy on the 'parallel'
    i axis."""
    best = minimum
    t = minimum
    while t <= target:
        n_pad = _round_up(max(n, minimum), t)
        if (n_pad // t >= 2) or (n <= minimum):
            if n_pad - n <= max(n_pad // 4, minimum):
                best = t
        t += minimum
    return best


# -----------------------------------------------------------------------------
# Stage 1: projection  h = x @ W (bf16 out),  f = h @ [a1 a2]  ((N, 2) f32)
# -----------------------------------------------------------------------------
def _proj_kernel(x_ref, w_ref, a12_ref, h_ref, f_ref):
    # x / W are bf16 (MXU fast path); accumulate in f32.
    h = jnp.dot(x_ref[...], w_ref[...], preferred_element_type=jnp.float32)
    h_ref[...] = h.astype(h_ref.dtype)
    # fused (Fout, 2) RHS: f[:, 0] = h . a1, f[:, 1] = h . a2 (kept f32 —
    # attention logits drive the softmax, so keep this path accurate).
    f_ref[...] = jnp.dot(h, a12_ref[...], preferred_element_type=jnp.float32)


# -----------------------------------------------------------------------------
# Stage 2: tiled attention with online softmax (flash-attention style)
# -----------------------------------------------------------------------------
def _attn_kernel(f1_ref, f2t_ref, adj_ref, v_ref, out_ref,
                 m_sc, l_sc, acc_sc, *, alpha, concat, tq, tn, v_resident):
    i = pl.program_id(0)
    j = pl.program_id(1)

    @pl.when(j == 0)
    def _():
        m_sc[...] = jnp.full_like(m_sc, -jnp.inf)
        l_sc[...] = jnp.zeros_like(l_sc)
        acc_sc[...] = jnp.zeros_like(acc_sc)

    # f1 / f2^T are grid-resident; slice the current window in-kernel.
    r0 = pl.multiple_of(i * tq, tq)
    c0 = pl.multiple_of(j * tn, tn)
    f1 = f1_ref[pl.ds(r0, tq), :]                  # (tq, 1)
    f2t = f2t_ref[:, pl.ds(c0, tn)]                # (1, tn), lane-major

    # e[q, k] = leakyrelu(f1_q + f2_k).  Padded columns carry f2 = -inf, so
    # they end up with exactly zero probability regardless of the adj pad.
    e = f1 + f2t                                   # (tq, tn) via broadcast
    e = jnp.maximum(e, alpha * e)                  # LeakyReLU(alpha), 0<alpha<1
    s = jnp.where(adj_ref[...] > 0, e, jnp.float32(-9e15))

    m_new = jnp.maximum(m_sc[...], jnp.max(s, axis=1, keepdims=True))
    corr = jnp.exp(m_sc[...] - m_new)              # rescale old stats
    p = jnp.exp(s - m_new)                         # (tq, tn) f32
    l_sc[...] = corr * l_sc[...] + jnp.sum(p, axis=1, keepdims=True)

    if v_resident:
        v = v_ref[pl.ds(c0, tn), :]                # slice of VMEM-resident h
    else:
        v = v_ref[...]                             # streamed (tn, fout) block
    acc_sc[...] = corr * acc_sc[...] + jnp.dot(
        p.astype(v.dtype), v, preferred_element_type=jnp.float32)
    m_sc[...] = m_new

    @pl.when(j == pl.num_programs(1) - 1)
    def _():
        # approx reciprocal (EUP) adds ~1e-3 rel. error to the normalisation;
        # acceptable for this layer's tolerance.
        hp = acc_sc[...] * pl.reciprocal(l_sc[...], approx=True)
        if concat:
            hp = jnp.where(hp > 0, hp, jnp.expm1(hp))   # ELU(alpha=1)
        out_ref[...] = hp.astype(out_ref.dtype)


# -----------------------------------------------------------------------------
# Wrapper
# -----------------------------------------------------------------------------
def gat_layer(x, W, a, adj, *, alpha=0.2, concat=True, tile=None,
              out_dtype=jnp.float32):
    """Pallas-backed GraphAttentionLayer forward (eval mode).

    tile: row/col tile size (multiple of 128).  Default: auto-picked (up to
    512) to amortise per-grid-step overhead while keeping >= 2 row tiles for
    v7x's two TensorCores and bounded padding waste.
    """
    N, fin = x.shape
    fout = W.shape[1]
    f32 = jnp.float32

    if tile is None:
        tile = _pick_tile(N)
    tq = tn = int(tile)                          # tq == tn -> no lcm blow-up
    n_pad = _round_up(max(N, tq), tq)
    fout_pad = _round_up(fout, 128)              # lane-dense output store
    # NOTE: with a single attention head fout_pad=128 fills only half of the
    # 256-wide MXU on v6e/v7x; multi-head variants should pack 2 heads' V
    # side-by-side.  Not applicable to this single-head module.

    # ---- input staging (bf16 for the MXU projection) -------------------------
    x_p = jnp.zeros((n_pad, fin), jnp.bfloat16).at[:N, :].set(
        x.astype(jnp.bfloat16))
    w_p = jnp.zeros((fin, fout_pad), jnp.bfloat16).at[:, :fout].set(
        W.astype(jnp.bfloat16))
    a12 = jnp.zeros((fout_pad, 2), f32)
    a12 = a12.at[:fout, 0].set(a[:fout, 0].astype(f32))
    a12 = a12.at[:fout, 1].set(a[fout:, 0].astype(f32))

    # int8 adjacency stream (4x smaller HBM traffic than f32).  Accept an
    # already-int8/bool adjacency; otherwise one fused compare+cast+pad.
    # Padded columns are flagged as "edges" but their logits are forced to
    # -inf via f2t below.
    if adj.dtype in (jnp.int8, jnp.bool_):
        adj_i8 = adj.astype(jnp.int8)
    else:
        adj_i8 = (adj > 0).astype(jnp.int8)
    adj_p = jnp.pad(adj_i8, ((0, n_pad - N), (0, n_pad - N)),
                    constant_values=1)

    n_row_tiles = n_pad // tq
    n_col_tiles = n_pad // tn

    # ---- stage 1: h (bf16), f1/f2 (f32) --------------------------------------
    h_bf16, f12 = pl.pallas_call(
        _proj_kernel,
        out_shape=(jax.ShapeDtypeStruct((n_pad, fout_pad), jnp.bfloat16),
                   jax.ShapeDtypeStruct((n_pad, 2), jnp.float32)),
        grid_spec=pltpu.PrefetchScalarGridSpec(
            num_scalar_prefetch=0,
            grid=(n_row_tiles,),
            in_specs=[
                pl.BlockSpec((tq, fin), lambda i: (i, 0)),
                pl.BlockSpec((fin, fout_pad), lambda i: (0, 0)),
                pl.BlockSpec((fout_pad, 2), lambda i: (0, 0)),
            ],
            out_specs=[
                pl.BlockSpec((tq, fout_pad), lambda i: (i, 0)),
                pl.BlockSpec((tq, 2), lambda i: (i, 0)),
            ]),
        compiler_params=pltpu.CompilerParams(
            dimension_semantics=("parallel",),
            vmem_limit_bytes=32 * 1024 * 1024),
    )(x_p, w_p, a12)

    f1 = f12[:, 0:1]                                   # (n_pad, 1)
    f2t = f12[:, 1:2].reshape(1, n_pad)                # (1, n_pad), lane-major
    col_valid = (jnp.arange(n_pad) < N)[None, :]
    f2t = jnp.where(col_valid, f2t, -jnp.inf)          # kill padded columns

    # ---- stage 2 VMEM budget --------------------------------------------------
    out_itemsize = jnp.dtype(out_dtype).itemsize
    v_bytes_total = n_pad * fout_pad * 2               # whole h_bf16
    v_resident = v_bytes_total <= (8 << 20)            # keep V in VMEM if small
    v_buf_bytes = v_bytes_total if v_resident else tn * fout_pad * 2
    vmem_needed = (
        2 * v_buf_bytes                     # V buffers (conservative x2)
        + 2 * tq * tn * 1                   # adj tile (int8), double-buffered
        + 2 * tq * fout_pad * out_itemsize  # out tile, double-buffered
        + tq * fout_pad * 4                 # f32 accumulator scratch
        + 2 * tq * 4                        # m, l scratch
        + 4 * n_pad * 4                     # f1 + f2t (x2 buffers each)
    )
    # Explicit limit: fits v7x's 64 MiB physical VMEM (cap 56 MiB), while
    # still raising the 16/32 MiB scoped defaults when the budget needs it.
    vmem_limit = int(min(max(vmem_needed + (8 << 20), 32 << 20), 56 << 20))

    # ---- stage 2: tiled attention + online softmax ----------------------------
    kernel = functools.partial(_attn_kernel, alpha=float(alpha),
                               concat=bool(concat), tq=tq, tn=tn,
                               v_resident=v_resident)
    in_specs = [
        pl.BlockSpec((n_pad, 1), lambda i, j: (0, 0)),      # f1 (grid-resident)
        pl.BlockSpec((1, n_pad), lambda i, j: (0, 0)),      # f2^T (grid-resident)
        pl.BlockSpec((tq, tn), lambda i, j: (i, j)),        # adj tile (int8)
    ]
    if v_resident:
        # whole h resident in VMEM -> no per-row-tile re-streaming from HBM
        in_specs.append(pl.BlockSpec((n_pad, fout_pad), lambda i, j: (0, 0)))
    else:
        in_specs.append(pl.BlockSpec((tn, fout_pad), lambda i, j: (j, 0)))

    out_p = pl.pallas_call(
        kernel,
        out_shape=jax.ShapeDtypeStruct((n_pad, fout_pad), out_dtype),
        grid_spec=pltpu.PrefetchScalarGridSpec(
            num_scalar_prefetch=0,
            grid=(n_row_tiles, n_col_tiles),           # reduction axis (j) last
            in_specs=in_specs,
            out_specs=pl.BlockSpec((tq, fout_pad), lambda i, j: (i, 0)),
            scratch_shapes=[
                pltpu.VMEM((tq, 1), jnp.float32),          # running max m
                pltpu.VMEM((tq, 1), jnp.float32),          # running sum l
                pltpu.VMEM((tq, fout_pad), jnp.float32),   # f32 accumulator
            ]),
        compiler_params=pltpu.CompilerParams(
            dimension_semantics=("parallel", "arbitrary"),  # i shards across TCs
            vmem_limit_bytes=vmem_limit),
    )(f1, f2t, adj_p, h_bf16)

    return out_p[:N, :fout]


# -----------------------------------------------------------------------------
# Reference + demo
# -----------------------------------------------------------------------------
def _xavier_uniform(key, shape, gain):
    fan_in, fan_out = shape[0], shape[1]
    limit = gain * jnp.sqrt(6.0 / (fan_in + fan_out))
    return jax.random.uniform(key, shape, jnp.float32, -limit, limit)


def _reference(x, W, a, adj, alpha, concat):
    """Pure-JAX f32 reference mirroring the PyTorch forward (eval mode)."""
    h = x @ W
    _, Fout = h.shape
    a1, a2 = a[:Fout, :], a[Fout:, :]
    e = (h @ a1) + (h @ a2).T
    e = jnp.where(e > 0, e, alpha * e)
    att = jnp.where(adj > 0, e, -9e15)
    att = jax.nn.softmax(att, axis=1)
    hp = att @ h
    return jax.nn.elu(hp) if concat else hp


if __name__ == "__main__":
    # Small deterministic problem. N / Fout deliberately NOT multiples of 128
    # so the padding path (and a multi-tile grid with true online softmax,
    # including column tiles containing padded/-inf columns) is exercised.
    N, IN_F, OUT_F = 192, 48, 64
    ALPHA = 0.2          # LeakyReLU negative slope
    CONCAT = True

    key = jax.random.PRNGKey(0)
    k_x, k_w, k_a, k_adj = jax.random.split(key, 4)

    x = jax.random.normal(k_x, (N, IN_F), jnp.float32)
    W = _xavier_uniform(k_w, (IN_F, OUT_F), gain=1.414)
    a = _xavier_uniform(k_a, (2 * OUT_F, 1), gain=1.414)

    # Random sparse-ish adjacency with guaranteed self-loops (so no row is
    # fully isolated; isolated rows would degenerate to a uniform average in
    # both kernel and reference).
    adj = (jax.random.uniform(k_adj, (N, N)) > 0.5).astype(jnp.float32)
    adj = jnp.maximum(adj, jnp.eye(N, dtype=jnp.float32))

    out = gat_layer(x, W, a, adj, alpha=ALPHA, concat=CONCAT)
    out = jax.block_until_ready(out)

    ref = _reference(x, W, a, adj, ALPHA, CONCAT)
    assert out.shape == (N, OUT_F)
    # Tolerance accounts for bf16 x@W (attention logits), bf16 P@V (both with
    # f32 accumulation) and the approx reciprocal in the softmax epilogue.
    max_err = float(jnp.max(jnp.abs(out - ref)))
    assert jnp.allclose(out, ref, atol=7.5e-2, rtol=5e-2), (
        f"mismatch vs reference (max abs err {max_err})")

    print("KERNEL_OK")
</pallas_src>

<mosaic_0001>
module attributes {stable_mosaic.version = 11 : i64} {
  func.func @_proj_kernel(%arg0: i32, %arg1: memref<128x48xbf16, #tpu.memory_space<vmem>>, %arg2: memref<48x128xbf16, #tpu.memory_space<vmem>>, %arg3: memref<128x2xf32, #tpu.memory_space<vmem>>, %arg4: memref<128x128xbf16, #tpu.memory_space<vmem>>, %arg5: memref<128x2xf32, #tpu.memory_space<vmem>>) attributes {dimension_semantics = [#tpu.dimension_semantics<parallel>], iteration_bounds = array<i64: 2>, scalar_prefetch = 0 : i64, scratch_operands = 0 : i64, tpu.core_type = #tpu.core_type<tc>, window_params = [{transform_indices = @transform_0, window_bounds = array<i64: 128, 48>}, {pipeline_mode = #tpu.pipeline_mode<synchronous>, transform_indices = @transform_1, window_bounds = array<i64: 48, 128>}, {pipeline_mode = #tpu.pipeline_mode<synchronous>, transform_indices = @transform_2, window_bounds = array<i64: 128, 2>}, {transform_indices = @transform_3, window_bounds = array<i64: 128, 128>}, {transform_indices = @transform_4, window_bounds = array<i64: 128, 2>}]} {
    %c0 = arith.constant 0 : index
    %c0_0 = arith.constant 0 : index
    %0 = vector.load %arg1[%c0, %c0_0] : memref<128x48xbf16, #tpu.memory_space<vmem>>, vector<128x48xbf16>
    %c0_1 = arith.constant 0 : index
    %c0_2 = arith.constant 0 : index
    %1 = vector.load %arg2[%c0_1, %c0_2] : memref<48x128xbf16, #tpu.memory_space<vmem>>, vector<48x128xbf16>
    %cst = arith.constant dense<0.000000e+00> : vector<128x128xf32>
    %2 = tpu.matmul %0, %1, %cst {dimension_numbers = #tpu.dot_dimension_numbers<[1], [0], [0], [1], [0, 0, 1, 1], [], []>} : vector<128x48xbf16>, vector<48x128xbf16>, vector<128x128xf32> -> vector<128x128xf32>
    %3 = arith.truncf %2 : vector<128x128xf32> to vector<128x128xbf16>
    %c0_3 = arith.constant 0 : index
    %c0_4 = arith.constant 0 : index
    %4 = vector.load %arg4[%c0_3, %c0_4] : memref<128x128xbf16, #tpu.memory_space<vmem>>, vector<128x128xbf16>
    tpu.vector_store %arg4[%c0_3, %c0_4], %3 {strides = array<i32>} : memref<128x128xbf16, #tpu.memory_space<vmem>>, vector<128x128xbf16>,
    %c0_5 = arith.constant 0 : index
    %c0_6 = arith.constant 0 : index
    %5 = vector.load %arg3[%c0_5, %c0_6] : memref<128x2xf32, #tpu.memory_space<vmem>>, vector<128x2xf32>
    %cst_7 = arith.constant dense<0.000000e+00> : vector<128x2xf32>
    %6 = tpu.matmul %2, %5, %cst_7 {dimension_numbers = #tpu.dot_dimension_numbers<[1], [0], [0], [1], [0, 0, 1, 1], [], []>} : vector<128x128xf32>, vector<128x2xf32>, vector<128x2xf32> -> vector<128x2xf32>
    %c0_8 = arith.constant 0 : index
    %c0_9 = arith.constant 0 : index
    %7 = vector.load %arg5[%c0_8, %c0_9] : memref<128x2xf32, #tpu.memory_space<vmem>>, vector<128x2xf32>
    tpu.vector_store %arg5[%c0_8, %c0_9], %6 {strides = array<i32>} : memref<128x2xf32, #tpu.memory_space<vmem>>, vector<128x2xf32>,
    return
  }
  func.func @transform_0(%arg0: i32) -> (i32, i32) {
    %c0_i32 = arith.constant 0 : i32
    %c0_i32_0 = arith.constant 0 : i32
    return %arg0, %c0_i32 : i32, i32
  }
  func.func @transform_1(%arg0: i32) -> (i32, i32) {
    %c0_i32 = arith.constant 0 : i32
    %c0_i32_0 = arith.constant 0 : i32
    %c0_i32_1 = arith.constant 0 : i32
    return %c0_i32, %c0_i32_0 : i32, i32
  }
  func.func @transform_2(%arg0: i32) -> (i32, i32) {
    %c0_i32 = arith.constant 0 : i32
    %c0_i32_0 = arith.constant 0 : i32
    %c0_i32_1 = arith.constant 0 : i32
    return %c0_i32, %c0_i32_0 : i32, i32
  }
  func.func @transform_3(%arg0: i32) -> (i32, i32) {
    %c0_i32 = arith.constant 0 : i32
    %c0_i32_0 = arith.constant 0 : i32
    return %arg0, %c0_i32 : i32, i32
  }
  func.func @transform_4(%arg0: i32) -> (i32, i32) {
    %c0_i32 = arith.constant 0 : i32
    %c0_i32_0 = arith.constant 0 : i32
    return %arg0, %c0_i32 : i32, i32
  }
}

</mosaic_0001>

<bundles_post_ra>
// kernel: tpu_custom_call.1
= control target key start
LH: loop header
LB: loop body
LE: loop exit
PB: predicated region body
PF: predicated region fallthrough
CT: control target
= control target key end

     0   :  { %10 = vsyncpa [#allocation3], 0  ;;  %s1443_s0 = inlined_call_operand.vmem [shape: bf16[256,48], index: 0, kind: input, shape index: {}]   ;;  %s1444_s1 = inlined_call_operand.vmem [shape: bf16[48,128], index: 1, kind: input, shape index: {}]   ;;  %s1445_s2 = inlined_call_operand.vmem [shape: f32[128,2], index: 2, kind: input, shape index: {}]   ;;  %s1446_s3 = inlined_call_operand.hbm [shape: bf16[256,128], index: 3, kind: output, shape index: {0}]   ;;  %s1447_s4 = inlined_call_operand.vmem [shape: f32[256,2], index: 4, kind: output, shape index: {1}]  }
   0x1   :  { %12 = vsyncpa [#allocation3 + $0x1], 0  ;;  %s1210_s15 = smov 0   ;;  %s1212_s16 = smov 0  }
   0x2   :  { %s1214_s17 = smov 0   ;;  %s1216_s18 = smov 0  }
   0x3 LB: > { %s1231_s19 = sadd.s32 4294967295, %s1180_s18   ;;  %s784_s20 = sadd.s32 4294967294, %s1180_s18   ;;  %s1180_s18 = sphi %s1216_s18, %s1453_s18   ;;  %s1176_s17 = sphi %s1214_s17, %s1452_s17   ;;  %s1172_s16 = sphi %s1212_s16, %s1451_s16   ;;  %s1168_s15 = sphi %s1210_s15, %s1450_s15  }
   0x4   : > { %s1235_s21 = sadd.s32 1, %s1180_s18   ;;  %s93_s22 = sadd.s32 1, %s1176_s17 }
   0x5   : > { %s90_s23 = ssub.s32 %s1180_s18, %s1235_s21  ;;  %p103_p0 = scmp.ne.s32.totalorder %s1176_s17, %s1172_s16 }
   0x6   : > { %p91_p1 = scmp.eq.s32.totalorder %s90_s23, 0  ;;  %p104_p2 = scmp.eq.s32.totalorder %s1231_s19, 1 }
   0x7   : > { %p109_p3 = scmp.ne.s32.totalorder %s1172_s16, %s1168_s15  ;;  %p110_p4 = scmp.eq.s32.totalorder %s784_s20, 1 }
   0x8   : > { %s1246_s24 = scalar_select %p91_p1, %s1176_s17, %s93_s22  }
   0x9   : > { %p1248_p5 = por %p104_p2, %p103_p0  ;;  %p1252_p6 = por %p110_p4, %p109_p3 }
   0xa   : > { %p787_p7 = scmp.ge.s32.totalorder %s1180_s18, 1  ;;  %p169_p8 = scmp.lt.s32.totalorder %s1180_s18, 3 }
   0xc   : > { %p170_p9 = pnand %p787_p7, %p169_p8 }
   0xd   : > { %v1107_v0 = vld [vmem:[%s1444_s1] sm:$0xff] (!%p170_p9)   ;;  %s789_s29 = sshll.u32 (!%p170_p9), %s1231_s19, 4  ;;  %v1108_v1 = vld [vmem:[%s1444_s1 + $0x8] sm:$0xff] (!%p170_p9)   ;;  %v498_v4 = vld [vmem:[%s1445_s2 + $0x10] sm:$0xff] (!%p170_p9)  ;;  %vm294_vm0 = vcmask (!%p170_p9), 392192   ;;  %s190_s13 = sand.u32 (!%p170_p9), 1, %s1172_s16  }
   0xe   : > { %173 = sbr.rel (%p170_p9) target bundleno = 483 (0x1e3), region = 32  ;;  %p201_p10 = scmp.lt.s32.totalorder (!%p170_p9), %s789_s29, 31  ;;  %940 = vmatprep.subr.bf16.mxu0 (!%p170_p9), %v1107_v0  ;;  %v496_v2 = vld [vmem:[%s1445_s2] sm:$0xff] (!%p170_p9)  ;;  %v497_v3 = vld [vmem:[%s1445_s2 + $0x8] sm:$0xff] (!%p170_p9)  ;;  %v1109_v5 = vld [vmem:[%s1444_s1 + $0x10] sm:$0xff] (!%p170_p9)  }
   0xf   : > { %941 = vmatpush3.bf16.msra.mxu0 (!%p170_p9), %v1107_v0  ;;  %v1018_v6 = vpack.c.bf16 (!%p170_p9), %v497_v3, %v496_v2  ;;  %v499_v7 = vld [vmem:[%s1445_s2 + $0x18] sm:$0xff] (!%p170_p9)  ;;  %v500_v9 = vld [vmem:[%s1445_s2 + $0x20] sm:$0xff] (!%p170_p9)  ;;  %v501_v10 = vld [vmem:[%s1445_s2 + $0x28] sm:$0xff] (!%p170_p9)  ;;  %s849_s20 = sshll.u32 (!%p170_p9), %s1231_s19, 10  ;;  %s1364_s5 = scalar_lea.sflag (!%p170_p9), [#allocation3], %s190_s13 }
  0x10   : > { %942 = vmatprep.subr.bf16.mxu0 (!%p170_p9), %v1108_v1  ;;  %v1022_v8 = vpack.c.bf16 (!%p170_p9), %v499_v7, %v498_v4  ;;  %v1026_v13 = vpack.c.bf16 (!%p170_p9), %v501_v10, %v500_v9  ;;  %v502_v14 = vld [vmem:[%s1445_s2 + $0x30] sm:$0xff] (!%p170_p9)  ;;  %v503_v16 = vld [vmem:[%s1445_s2 + $0x38] sm:$0xff] (!%p170_p9)  ;;  %v504_v18 = vld [vmem:[%s1445_s2 + $0x40] sm:$0xff] (!%p170_p9)  ;;  %s1358_s30 = scalar_lea.hbm (!%p170_p9), %s1446_s3, %s849_s20  ;;  %s1182_s19 = smov (!%p170_p9), [#allocation2]  }
  0x11   : > { %1050 = vmatprep.subr.bf16.mxu1 (!%p170_p9), %v1018_v6  ;;  %v1030_v17 = vpack.c.bf16 (!%p170_p9), %v503_v16, %v502_v14  ;;  %v505_v19 = vld [vmem:[%s1445_s2 + $0x48] sm:$0xff] (!%p170_p9)  ;;  %v506_v23 = vld [vmem:[%s1445_s2 + $0x50] sm:$0xff] (!%p170_p9)  ;;  %v507_v24 = vld [vmem:[%s1445_s2 + $0x58] sm:$0xff] (!%p170_p9)  ;;  %s1122_s7 = sshll.u32 (!%p170_p9), %s1182_s19, 4  ;;  %s1123_s7 = int_to_ptr.vmem [resolvable:$false] %s1122_s7 }
  0x12   : > { %1058 = vmatpush3.bf16.msra.mxu1 (!%p170_p9), %v1018_v6  ;;  %v1034_v22 = vpack.c.bf16 (!%p170_p9), %v505_v19, %v504_v18  ;;  %v1038_v25 = vpack.c.bf16 (!%p170_p9), %v507_v24, %v506_v23  ;;  %v508_v26 = vld [vmem:[%s1445_s2 + $0x60] sm:$0xff] (!%p170_p9)  ;;  %v509_v27 = vld [vmem:[%s1445_s2 + $0x68] sm:$0xff] (!%p170_p9)  ;;  %v510_v32 = vld [vmem:[%s1445_s2 + $0x70] sm:$0xff] (!%p170_p9)  ;;  %s1124_s8 = scalar_lea.vmem (!%p170_p9), %s1123_s7, 2048 }
  0x13   : > { %943 = vmatpush3.bf16.msra.mxu0 (!%p170_p9), %v1108_v1  ;;  %1051 = vmatprep.subr.bf16.mxu1 (!%p170_p9), %v1022_v8  ;;  %v1042_v30 = vpack.c.bf16 (!%p170_p9), %v509_v27, %v508_v26  ;;  %v511_v33 = vld [vmem:[%s1445_s2 + $0x78] sm:$0xff] (!%p170_p9) }
  0x14   : > { %944 = vmatprep.subr.bf16.mxu0 (!%p170_p9), %v1109_v5  ;;  %v1046_v34 = vpack.c.bf16 (!%p170_p9), %v511_v33, %v510_v32 }
  0x15   : > { %s1455_s29 = smov (!%p201_p10, %s789_s29), 31 }
  0x16   : > { %s790_s22 = sshll.u32 %s1455_s29, 2  ;;  %1059 = vmatpush3.bf16.msra.mxu1 %v1022_v8 }
  0x17   : > { %s1286_s28 = scalar_lea.vmem %s1443_s0, %s790_s22  ;;  %945 = vmatpush3.bf16.msra.mxu0 %v1109_v5  ;;  %1052 = vmatprep.subr.bf16.mxu1 %v1026_v13 }
  0x18   : > { %v1110_v11 = vld [vmem:[%s1286_s28] sm:$0xff]   ;;  %v1111_v12 = vld [vmem:[%s1286_s28 + $0x8] sm:$0xff]   ;;  %v1112_v15 = vld [vmem:[%s1286_s28 + $0x10] sm:$0xff]   ;;  %1019 = vmatprep.subr.bf16.mxu0 %v1018_v6 }
  0x19   : > { %946 = vmatprep.mubr.msk.bf16.mxu0 %vm294_vm0, %v1110_v11  ;;  %v1113_v20 = vld [vmem:[%s1286_s28 + $0x18] sm:$0xff]   ;;  %v1114_v21 = vld [vmem:[%s1286_s28 + $0x20] sm:$0xff]   ;;  %v1115_v28 = vld [vmem:[%s1286_s28 + $0x28] sm:$0xff]  }
  0x1a   : > { %947 = vmatmul.mubr.msk.bf16.vlgmr.msra.gmra.mrb[0].mxu0 %vm294_vm0, %v1111_v12  ;;  %1060 = vmatpush3.bf16.msra.mxu1 %v1026_v13  ;;  %v1116_v29 = vld [vmem:[%s1286_s28 + $0x30] sm:$0xff]   ;;  %v1117_v31 = vld [vmem:[%s1286_s28 + $0x38] sm:$0xff]   ;;  %s788_s28 = sshll.u32 %s190_s13, 6 }
  0x1b   : > { %950 = vmatprep.mubr.msk.bf16.mxu0 %vm294_vm0, %v1112_v15  ;;  %1021 = vmatpush3.bf16.msra.mxu0 %v1018_v6  ;;  %s1343_s14 = scalar_lea.vmem [#allocation2], %s788_s28 }
  0x1c   : > { %1023 = vmatprep.subr.bf16.mxu0 %v1022_v8  ;;  %1053 = vmatprep.subr.bf16.mxu1 %v1030_v17  ;;  %s693_s22 = sshll.u32 %s1343_s14, 4  ;;  %s1360_s22 = int_to_ptr.vmem [resolvable:$true] %s693_s22 }
  0x1d   : > { %s1118_s6 = scalar_lea.vmem %s1360_s22, 1024  ;;  %p1125_p0 = scmp.lt.s32.totalorder %s1360_s22, %s1123_s7 }
  0x1e   : > { %1061 = vmatpush3.bf16.msra.mxu1 %v1030_v17  ;;  %p1119_p11 = scmp.ne.s32.totalorder %s1360_s22, %s1118_s6  ;;  %p1126_p1 = scmp.lt.s32.totalorder %s1124_s8, %s1118_s6 }
  0x1f   : > { %1025 = vmatpush3.bf16.msra.mxu0 %v1022_v8  ;;  %1054 = vmatprep.subr.bf16.mxu1 %v1034_v22 }
  0x20   : > { %1027 = vmatprep.subr.bf16.mxu0 %v1026_v13  ;;  %p1120_p12 = pnand %p1119_p11, %p1248_p5  ;;  %p1127_p2 = por %p1126_p1, %p1125_p0 }
  0x22   : > { %951 = vmatmul.mubr.msk.bf16.gmra.mrb[4].mxu0 %vm294_vm0, %v1113_v20  ;;  %1062 = vmatpush3.bf16.msra.mxu1 %v1034_v22  ;;  %p1121_p13 = pneg %p1120_p12 }
  0x23   : > { %954 = vmatprep.mubr.msk.bf16.mxu0 %vm294_vm0, %v1114_v21  ;;  %1029 = vmatpush3.bf16.msra.mxu0 %v1026_v13 }
  0x24   : > { %1031 = vmatprep.subr.bf16.mxu0 %v1030_v17  ;;  %1055 = vmatprep.subr.bf16.mxu1 %v1038_v25  ;;  %p1128_p3 = pnand %p1127_p2, %p1121_p13 }
  0x26   : > { %1063 = vmatpush3.bf16.msra.mxu1 %v1038_v25 }
  0x27   : > { %1033 = vmatpush3.bf16.msra.mxu0 %v1030_v17  ;;  %1056 = vmatprep.subr.bf16.mxu1 %v1042_v30 }
  0x28   : > { %1035 = vmatprep.subr.bf16.mxu0 %v1034_v22 }
  0x2a   : > { %955 = vmatmul.mubr.msk.bf16.gmra.mrb[8].mxu0 %vm294_vm0, %v1115_v28  ;;  %1064 = vmatpush3.bf16.msra.mxu1 %v1042_v30 }
  0x2b   : > { %958 = vmatprep.mubr.msk.bf16.mxu0 %vm294_vm0, %v1116_v29  ;;  %1037 = vmatpush3.bf16.msra.mxu0 %v1034_v22 }
  0x2c   : > { %1039 = vmatprep.subr.bf16.mxu0 %v1038_v25  ;;  %1057 = vmatprep.subr.bf16.mxu1 %v1046_v34 }
  0x2e   : > { %1065 = vmatpush3.bf16.msra.mxu1 %v1046_v34 }
  0x2f   : > { %1041 = vmatpush3.bf16.msra.mxu0 %v1038_v25 }
  0x30   : > { %1043 = vmatprep.subr.bf16.mxu0 %v1042_v30 }
  0x32   : > { %959 = vmatmul.mubr.msk.bf16.gmra.mrb[12].mxu0 %vm294_vm0, %v1117_v31 }
  0x33   : > { %1045 = vmatpush3.bf16.msra.mxu0 %v1042_v30 }
  0x34   : > { %1047 = vmatprep.subr.bf16.mxu0 %v1046_v34 }
  0x37   : > { %1049 = vmatpush3.bf16.msra.mxu0 %v1046_v34 }
  0xed   : > { %v948_v35 = vpop.f32.mrb[0].mxu0 }
  0xee   : > { %v353_v36 = vpop.f32.mrb[1].mxu0 }
  0xef   : > { %v949_v37 = vpop.f32.mrb[2].mxu0  ;;  %994 = vmatprep.mubr.f32.mxu0 %v353_v36 }
  0xf0   : > { %v858_v38 = vpack.c.bf16 %v949_v37, %v948_v35  ;;  %v356_v39 = vpop.f32.mrb[3].mxu0 }
  0xf1   : > { %v853_v40 = vpack.c.bf16 %v356_v39, %v353_v36  ;;  %995 = vmatmul.mubr.f32.vlgmr.msra.gmra.mrb[16].mxu0 %v356_v39 }
  0xf2   : > { %890 = vst [vmem:[%s1343_s14 + $0x8] sm:$0xff] %v858_v38   ;;  %997 = vmatprep.mubr.f32.mxu0 %v948_v35 }
  0xf3   : > { %854 = vst [vmem:[%s1343_s14] sm:$0xff] %v853_v40  }
  0xf5   : > { %v952_v41 = vpop.f32.mrb[4].mxu0  ;;  %998 = vmatmul.mubr.f32.gmra.mrb[18].mxu0 %v949_v37 }
  0xf6   : > { %v369_v42 = vpop.f32.mrb[5].mxu0 }
  0xf7   : > { %v953_v43 = vpop.f32.mrb[6].mxu0  ;;  %1000 = vmatprep.mubr.f32.mxu1 %v369_v42 }
  0xf8   : > { %v868_v44 = vpack.c.bf16 %v953_v43, %v952_v41  ;;  %v372_v45 = vpop.f32.mrb[7].mxu0 }
  0xf9   : > { %v863_v46 = vpack.c.bf16 %v372_v45, %v369_v42  ;;  %1001 = vmatmul.mubr.f32.vlgmr.msra.gmra.mrb[0].mxu1 %v372_v45 }
  0xfa   : > { %892 = vst [vmem:[%s1343_s14 + $0x18] sm:$0xff] %v868_v44   ;;  %1003 = vmatprep.mubr.f32.mxu1 %v952_v41 }
  0xfb   : > { %891 = vst [vmem:[%s1343_s14 + $0x10] sm:$0xff] %v863_v46  }
  0xfd   : > { %v956_v47 = vpop.f32.mrb[8].mxu0  ;;  %1004 = vmatmul.mubr.f32.gmra.mrb[2].mxu1 %v953_v43 }
  0xfe   : > { %v385_v48 = vpop.f32.mrb[9].mxu0 }
  0xff   : > { %v957_v49 = vpop.f32.mrb[10].mxu0  ;;  %1006 = vmatprep.mubr.f32.mxu1 %v385_v48 }
 0x100   : > { %v878_v50 = vpack.c.bf16 %v957_v49, %v956_v47  ;;  %v388_v51 = vpop.f32.mrb[11].mxu0 }
 0x101   : > { %v873_v52 = vpack.c.bf16 %v388_v51, %v385_v48  ;;  %1007 = vmatmul.mubr.f32.gmra.mrb[4].mxu1 %v388_v51 }
 0x102   : > { %894 = vst [vmem:[%s1343_s14 + $0x28] sm:$0xff] %v878_v50   ;;  %1009 = vmatprep.mubr.f32.mxu1 %v956_v47 }
 0x103   : > { %893 = vst [vmem:[%s1343_s14 + $0x20] sm:$0xff] %v873_v52  }
 0x105   : > { %v960_v53 = vpop.f32.mrb[12].mxu0  ;;  %1010 = vmatmul.mubr.f32.gmra.mrb[6].mxu1 %v957_v49 }
 0x106   : > { %v401_v54 = vpop.f32.mrb[13].mxu0 }
 0x107   : > { %v961_v55 = vpop.f32.mrb[14].mxu0  ;;  %1012 = vmatprep.mubr.f32.mxu1 %v401_v54 }
 0x108   : > { %v888_v56 = vpack.c.bf16 %v961_v55, %v960_v53  ;;  %v404_v57 = vpop.f32.mrb[15].mxu0 }
 0x109   : > { %v883_v58 = vpack.c.bf16 %v404_v57, %v401_v54  ;;  %1013 = vmatmul.mubr.f32.gmra.mrb[8].mxu1 %v404_v57 }
 0x10a   : > { %896 = vst [vmem:[%s1343_s14 + $0x38] sm:$0xff] %v888_v56   ;;  %1015 = vmatprep.mubr.f32.mxu1 %v960_v53 }
 0x10b   : > { %895 = vst [vmem:[%s1343_s14 + $0x30] sm:$0xff] %v883_v58  }
 0x10d   : > { %1016 = vmatmul.mubr.f32.gmra.mrb[10].mxu1 %v961_v55 }
 0x10e   : > { %1131 = shalt.err (!%p1128_p3)
}
 0x10f   : > { %s1132_s9 = scalar_lea.hbm %s1358_s30, 1024  ;;  %s1136_s12 = scalar_lea.hbm %s1446_s3, 2048 }
 0x110   : > { %p1133_p4 = scmp.ne.s32.totalorder %s1358_s30, %s1132_s9  ;;  %p1137_p9 = scmp.lt.u32.totalorder %s1358_s30, %s1446_s3 }
 0x111   : > { %p1138_p10 = scmp.lt.u32.totalorder %s1136_s12, %s1132_s9  ;;  %p1140_p12 = scmp.lt.u32.totalorder %s1132_s9, %s1358_s30 }
 0x112   : > { %p1134_p7 = pnand %p1133_p4, %p1248_p5 }
 0x113   : > { %p1139_p11 = por %p1138_p10, %p1137_p9 }
 0x114   : > { %p1135_p8 = pneg %p1134_p7 }
 0x115   : > { %p1141_p13 = por %p1140_p12, %p1139_p11 }
 0x117   : > { %p1142_p0 = pnand %p1141_p13, %p1135_p8 }
 0x119   : > { %1145 = shalt.err (!%p1142_p0)
}
 0x11a   : > { %s1183_s14 = smov 64   ;;  %s1184_s20 = smov 4   ;;  %vm657_vm1 = vcmask 15360  }
 0x11b   : > { %1066 = dma.vmem_to_hbm [thread:$0]  (%p1248_p5), %s1360_s22, 1024, %s1358_s30, %s1364_s5, %s1183_s14, %s1183_s14, %s1184_s20  }
 0x11c   : > { %s792_s23 = sshll.u32 %s1455_s29, 3 }
 0x11d   : > { %s1392_s19 = scalar_lea.vmem %s1447_s4, %s792_s23 }
 0x1c4   : > { %v996_v59 = vpop.f32.mrb[16].mxu0 }
 0x1c5   : > { %659 = vst.msk [vmem:[%s1392_s19 + $0x8] sm:$0xff] %vm657_vm1, %v996_v59  ;;  %v578_v60 = vpop.f32.mrb[17].mxu0 }
 0x1c6   : > { %658 = vst.msk [vmem:[%s1392_s19] sm:$0xff] %vm657_vm1, %v578_v60 }
 0x1c8   : > { %v999_v61 = vpop.f32.mrb[18].mxu0 }
 0x1c9   : > { %661 = vst.msk [vmem:[%s1392_s19 + $0x18] sm:$0xff] %vm657_vm1, %v999_v61  ;;  %v588_v62 = vpop.f32.mrb[19].mxu0 }
 0x1ca   : > { %660 = vst.msk [vmem:[%s1392_s19 + $0x10] sm:$0xff] %vm657_vm1, %v588_v62 }
 0x1cc   : > { %v1002_v63 = vpop.f32.mrb[0].mxu1 }
 0x1cd   : > { %663 = vst.msk [vmem:[%s1392_s19 + $0x28] sm:$0xff] %vm657_vm1, %v1002_v63  ;;  %v598_v0 = vpop.f32.mrb[1].mxu1 }
 0x1ce   : > { %662 = vst.msk [vmem:[%s1392_s19 + $0x20] sm:$0xff] %vm657_vm1, %v598_v0 }
 0x1d0   : > { %v1005_v1 = vpop.f32.mrb[2].mxu1 }
 0x1d1   : > { %665 = vst.msk [vmem:[%s1392_s19 + $0x38] sm:$0xff] %vm657_vm1, %v1005_v1  ;;  %v608_v2 = vpop.f32.mrb[3].mxu1 }
 0x1d2   : > { %664 = vst.msk [vmem:[%s1392_s19 + $0x30] sm:$0xff] %vm657_vm1, %v608_v2 }
 0x1d4   : > { %v1008_v3 = vpop.f32.mrb[4].mxu1 }
 0x1d5   : > { %667 = vst.msk [vmem:[%s1392_s19 + $0x48] sm:$0xff] %vm657_vm1, %v1008_v3  ;;  %v618_v4 = vpop.f32.mrb[5].mxu1 }
 0x1d6   : > { %666 = vst.msk [vmem:[%s1392_s19 + $0x40] sm:$0xff] %vm657_vm1, %v618_v4 }
 0x1d8   : > { %v1011_v5 = vpop.f32.mrb[6].mxu1 }
 0x1d9   : > { %669 = vst.msk [vmem:[%s1392_s19 + $0x58] sm:$0xff] %vm657_vm1, %v1011_v5  ;;  %v628_v6 = vpop.f32.mrb[7].mxu1 }
 0x1da   : > { %668 = vst.msk [vmem:[%s1392_s19 + $0x50] sm:$0xff] %vm657_vm1, %v628_v6 }
 0x1dc   : > { %v1014_v7 = vpop.f32.mrb[8].mxu1 }
 0x1dd   : > { %671 = vst.msk [vmem:[%s1392_s19 + $0x68] sm:$0xff] %vm657_vm1, %v1014_v7  ;;  %v638_v8 = vpop.f32.mrb[9].mxu1 }
 0x1de   : > { %670 = vst.msk [vmem:[%s1392_s19 + $0x60] sm:$0xff] %vm657_vm1, %v638_v8 }
 0x1e0   : > { %v1017_v9 = vpop.f32.mrb[10].mxu1 }
 0x1e1   : > { %673 = vst.msk [vmem:[%s1392_s19 + $0x78] sm:$0xff] %vm657_vm1, %v1017_v9  ;;  %v648_v10 = vpop.f32.mrb[11].mxu1 }
 0x1e2   : > { %672 = vst.msk [vmem:[%s1392_s19 + $0x70] sm:$0xff] %vm657_vm1, %v648_v10 }
 0x1e3 PF: > { %p1072_p5 = scmp.ge.s32.totalorder %s1180_s18, 2  ;;  %s712_s25 = sand.u32 1, %s1168_s15  }
 0x1e4   : > { %s713_s29 = scalar_lea.sflag [#allocation3], %s712_s25 }
 0x1e5   : > { %p1069_p1 = pnand %p1072_p5, %p1252_p6 }
 0x1e7   : > { %1163 = dma.done.wait (!%p1069_p1), %s713_s29, 1024  }
 0x1e8   : > { %1165 = vsyncadd (!%p1069_p1), %s713_s29, 4294966272  ;;  %p15_p2 = scmp.ge.s32.totalorder %s1235_s21, 4   ;;  %s1450_s15 = smov %s1172_s16 }
 0x1e9   : > { %s1451_s16 = smov %s1176_s17  ;;  %s1452_s17 = smov %s1246_s24 }
 0x1ea   : > { %s1453_s18 = smov %s1235_s21  ;;  %17 = sbr.rel (!%p15_p2) target bundleno = 3 (0x3), region = 79 }
 0x1f1   :  { %726 = vsyncpa [#allocation3], 1 }
 0x1f2   :  { %728 = vsyncpa [#allocation3 + $0x1], 1 }

</bundles_post_ra>
